<compile_context>
chip_gen: v6e
topology: v6e:2x2x1
jax: 0.10.0
libtpu: 0.0.40
codegen_flags: <defaults>
</compile_context>

<pallas_src>
import jax
import jax.numpy as jnp
from jax.experimental import pallas as pl
from jax.experimental.pallas import tpu as pltpu

# --- model hyper-parameters (small, consistent with the module) -------------
EMBED_SIZE = 32
NUM_HEADS = 4
HEAD_SIZE = EMBED_SIZE // NUM_HEADS    # 8
BLOCK_SIZE = 64                        # max context (T <= BLOCK_SIZE)
BATCH = 2
SEQ = 8                                # T
LN_EPS = 1e-5


def _layer_norm(v, w, b):
    # w, b are (1, E) rows -> sublane broadcast against (N, E)
    mu = jnp.mean(v, axis=-1, keepdims=True)
    var = jnp.mean((v - mu) ** 2, axis=-1, keepdims=True)   # biased, like PyTorch
    return (v - mu) * jax.lax.rsqrt(var + LN_EPS) * w + b


def transformer_block(x, params):
    B, T, E = x.shape
    H = NUM_HEADS
    hs = E // H
    N = B * T
    H4 = 4 * E
    # NOTE: embed-size scaling (C ** -0.5), intentionally matching the
    # reference module (NOT head_size ** -0.5). Folded into the Q weight below.
    scale = E ** (-0.5)

    # ---- one-time layout prep OUTSIDE the kernel (tiny XLA ops) ------------
    x2d = x.reshape(N, E)                                          # (N, E)

    # fused QKV weight: [wq.T * scale | wk.T | wv.T | 0-pad] -> (E, 128)
    wqkv = jnp.concatenate(
        [params["wq"].T * scale, params["wk"].T, params["wv"].T,
         jnp.zeros((E, 128 - 3 * E), x.dtype)], axis=1)            # (E, 128)
    w1T = params["w1"].T                                           # (E, 4E) = (32, 128)
    w_wide = jnp.concatenate([wqkv, w1T], axis=0)                  # (2E, 128) = (64, 128)

    wpT = params["wp"].T                                           # (E, E)
    w2T = params["w2"].T                                           # (4E, E)
    w_narrow = jnp.concatenate([wpT, w2T], axis=0)                 # (E+4E, E) = (160, 32)

    def row(v):
        return jnp.pad(v, (0, 128 - v.shape[0]))[None, :]          # (1, 128)

    vec_slab = jnp.concatenate([
        row(params["ln1_w"]),   # row 0
        row(params["ln1_b"]),   # row 1
        row(params["ln2_w"]),   # row 2
        row(params["ln2_b"]),   # row 3
        row(params["bp"]),      # row 4
        row(params["b2"]),      # row 5
        row(params["b1"]),      # row 6 (exactly 128 wide)
        jnp.zeros((1, 128), x.dtype),  # row 7 (pad to 8 sublanes)
    ], axis=0)                                                     # (8, 128)

    def kernel(x_ref, ww_ref, wn_ref, vec_ref, o_ref):
        xf = x_ref[...]                                            # (N, E) f32

        ln1w = vec_ref[0:1, 0:E]
        ln1b = vec_ref[1:2, 0:E]
        ln2w = vec_ref[2:3, 0:E]
        ln2b = vec_ref[3:4, 0:E]
        bp = vec_ref[4:5, 0:E]
        b2 = vec_ref[5:6, 0:E]
        b1 = vec_ref[6:7, :]                                       # (1, 4E)

        # ---- LN1 + fused QKV projection (one MXU push) ----
        xn1 = _layer_norm(xf, ln1w, ln1b)
        qkv = jnp.dot(xn1, ww_ref[0:E, :],
                      preferred_element_type=jnp.float32)          # (N, 128)

        # causal mask, built once per (single) invocation
        row_i = jax.lax.broadcasted_iota(jnp.int32, (T, T), 0)
        col_i = jax.lax.broadcasted_iota(jnp.int32, (T, T), 1)
        causal = (col_i <= row_i)[None, :, :]                      # (1, T, T)

        # ---- per-head causal attention (scale already folded into Q) ----
        heads = []
        for h in range(H):                                         # static, unrolled
            qh = qkv[:, h * hs:(h + 1) * hs].reshape(B, T, hs)
            kh = qkv[:, E + h * hs:E + (h + 1) * hs].reshape(B, T, hs)
            vh = qkv[:, 2 * E + h * hs:2 * E + (h + 1) * hs].reshape(B, T, hs)

            s = jnp.einsum("bqd,bkd->bqk", qh, kh,
                           preferred_element_type=jnp.float32)     # (B, T, T)
            # diagonal always unmasked -> row max finite -> exp(-inf) = 0 safe
            s = jnp.where(causal, s, -jnp.inf)
            s = s - jnp.max(s, axis=-1, keepdims=True)
            p = jnp.exp(s)
            # exact divide kept for the 1e-4 tolerance (pl.reciprocal(approx=True)
            # would be the EUP-slot variant at larger shapes)
            p = p / jnp.sum(p, axis=-1, keepdims=True)
            # dropout(0.1) on attention probs: identity in eval mode
            oh = jnp.einsum("bqk,bkd->bqd", p, vh,
                            preferred_element_type=jnp.float32)    # (B, T, hs)
            heads.append(oh.reshape(N, hs))

        # ---- fused output projection (one MXU push) ----
        heads2d = jnp.concatenate(heads, axis=-1)                  # (N, E)
        att = jnp.dot(heads2d, wn_ref[0:E, :],
                      preferred_element_type=jnp.float32) + bp
        # dropout(0.1) on proj output: identity in eval mode
        x1 = xf + att

        # ---- LN2 + feed-forward ----
        xn2 = _layer_norm(x1, ln2w, ln2b)
        h1 = jnp.dot(xn2, ww_ref[E:2 * E, :],
                     preferred_element_type=jnp.float32) + b1      # (N, 4E)
        h1 = jnp.maximum(h1, 0.0)                                  # ReLU
        h2 = jnp.dot(h1, wn_ref[E:E + H4, :],
                     preferred_element_type=jnp.float32) + b2      # (N, E)
        # dropout(0.1) on ff output: identity in eval mode

        y = x1 + h2                                                # (N, E)
        o_ref[...] = y.astype(o_ref.dtype)

    def full(shape):
        return pl.BlockSpec(shape, lambda i, n=len(shape): (0,) * n)

    out2d = pl.pallas_call(
        kernel,
        out_shape=jax.ShapeDtypeStruct((N, E), x.dtype),
        grid_spec=pltpu.PrefetchScalarGridSpec(
            num_scalar_prefetch=0,
            grid=(1,),                          # whole batch in one invocation
            in_specs=[
                full((N, E)),                   # x rows
                full((2 * E, 128)),             # [Wqkv_padded ; W1.T]
                full((E + H4, E)),              # [Wp.T ; W2.T]
                full((8, 128)),                 # ln/bias vector slab
            ],
            out_specs=full((N, E)),
        ),
        compiler_params=pltpu.CompilerParams(
            dimension_semantics=("arbitrary",)),
    )(x2d, w_wide, w_narrow, vec_slab)
    return out2d.reshape(B, T, E)


# ------------------- pure-JAX reference (for verification) ------------------
def transformer_block_ref(x, p):
    B, T, E = x.shape
    scale = E ** (-0.5)

    def ln(v, w, b):
        mu = jnp.mean(v, axis=-1, keepdims=True)
        var = jnp.mean((v - mu) ** 2, axis=-1, keepdims=True)
        return (v - mu) / jnp.sqrt(var + LN_EPS) * w + b

    xn1 = ln(x, p["ln1_w"], p["ln1_b"])
    q = xn1 @ p["wq"].T
    k = xn1 @ p["wk"].T
    v = xn1 @ p["wv"].T
    mask = jnp.tril(jnp.ones((T, T), bool))
    outs = []
    for h in range(NUM_HEADS):
        sl = slice(h * HEAD_SIZE, (h + 1) * HEAD_SIZE)
        wei = jnp.einsum("btd,bsd->bts", q[..., sl], k[..., sl]) * scale
        wei = jnp.where(mask, wei, -jnp.inf)
        wei = jax.nn.softmax(wei, axis=-1)
        outs.append(jnp.einsum("bts,bsd->btd", wei, v[..., sl]))
    att = jnp.concatenate(outs, axis=-1) @ p["wp"].T + p["bp"]
    x1 = x + att
    xn2 = ln(x1, p["ln2_w"], p["ln2_b"])
    h1 = jax.nn.relu(xn2 @ p["w1"].T + p["b1"])
    return x1 + (h1 @ p["w2"].T + p["b2"])


def init_params(key, E):
    keys = jax.random.split(key, 8)
    s = 0.02
    return {
        "ln1_w": jnp.ones((E,), jnp.float32),
        "ln1_b": jnp.zeros((E,), jnp.float32),
        "wq": s * jax.random.normal(keys[0], (E, E), jnp.float32),
        "wk": s * jax.random.normal(keys[1], (E, E), jnp.float32),
        "wv": s * jax.random.normal(keys[2], (E, E), jnp.float32),
        "wp": s * jax.random.normal(keys[3], (E, E), jnp.float32),
        "bp": s * jax.random.normal(keys[4], (E,), jnp.float32),
        "ln2_w": jnp.ones((E,), jnp.float32),
        "ln2_b": jnp.zeros((E,), jnp.float32),
        "w1": s * jax.random.normal(keys[5], (4 * E, E), jnp.float32),
        "b1": jnp.zeros((4 * E,), jnp.float32),
        "w2": s * jax.random.normal(keys[6], (E, 4 * E), jnp.float32),
        "b2": jnp.zeros((E,), jnp.float32),
    }


if __name__ == "__main__":
    key = jax.random.PRNGKey(0)
    kx, kp = jax.random.split(key)
    x = jax.random.normal(kx, (BATCH, SEQ, EMBED_SIZE), jnp.float32)
    params = init_params(kp, EMBED_SIZE)

    out = jax.jit(transformer_block)(x, params)
    out = jax.block_until_ready(out)

    ref = transformer_block_ref(x, params)
    assert out.shape == (BATCH, SEQ, EMBED_SIZE)
    assert jnp.allclose(out, ref, atol=1e-4, rtol=1e-4), "mismatch vs reference"

    print("KERNEL_OK")
</pallas_src>

<mosaic_0001>
module attributes {stable_mosaic.version = 11 : i64} {
  func.func @kernel(%arg0: i32, %arg1: memref<16x32xf32, #tpu.memory_space<vmem>>, %arg2: memref<64x128xf32, #tpu.memory_space<vmem>>, %arg3: memref<160x32xf32, #tpu.memory_space<vmem>>, %arg4: memref<8x128xf32, #tpu.memory_space<vmem>>, %arg5: memref<16x32xf32, #tpu.memory_space<vmem>>) attributes {dimension_semantics = [#tpu.dimension_semantics<arbitrary>], iteration_bounds = array<i64: 1>, scalar_prefetch = 0 : i64, scratch_operands = 0 : i64, tpu.core_type = #tpu.core_type<tc>, window_params = [{pipeline_mode = #tpu.pipeline_mode<synchronous>, transform_indices = @transform_0, window_bounds = array<i64: 16, 32>}, {pipeline_mode = #tpu.pipeline_mode<synchronous>, transform_indices = @transform_1, window_bounds = array<i64: 64, 128>}, {pipeline_mode = #tpu.pipeline_mode<synchronous>, transform_indices = @transform_2, window_bounds = array<i64: 160, 32>}, {pipeline_mode = #tpu.pipeline_mode<synchronous>, transform_indices = @transform_3, window_bounds = array<i64: 8, 128>}, {pipeline_mode = #tpu.pipeline_mode<synchronous>, transform_indices = @transform_4, window_bounds = array<i64: 16, 32>}]} {
    %c0 = arith.constant 0 : index
    %c0_0 = arith.constant 0 : index
    %0 = vector.load %arg1[%c0, %c0_0] : memref<16x32xf32, #tpu.memory_space<vmem>>, vector<16x32xf32>
    %c0_1 = arith.constant 0 : index
    %c0_2 = arith.constant 0 : index
    %1 = vector.load %arg4[%c0_1, %c0_2] : memref<8x128xf32, #tpu.memory_space<vmem>>, vector<1x32xf32>
    %c1 = arith.constant 1 : index
    %c0_3 = arith.constant 0 : index
    %2 = vector.load %arg4[%c1, %c0_3] : memref<8x128xf32, #tpu.memory_space<vmem>>, vector<1x32xf32>
    %c2 = arith.constant 2 : index
    %c0_4 = arith.constant 0 : index
    %3 = vector.load %arg4[%c2, %c0_4] : memref<8x128xf32, #tpu.memory_space<vmem>>, vector<1x32xf32>
    %c3 = arith.constant 3 : index
    %c0_5 = arith.constant 0 : index
    %4 = vector.load %arg4[%c3, %c0_5] : memref<8x128xf32, #tpu.memory_space<vmem>>, vector<1x32xf32>
    %c4 = arith.constant 4 : index
    %c0_6 = arith.constant 0 : index
    %5 = vector.load %arg4[%c4, %c0_6] : memref<8x128xf32, #tpu.memory_space<vmem>>, vector<1x32xf32>
    %c5 = arith.constant 5 : index
    %c0_7 = arith.constant 0 : index
    %6 = vector.load %arg4[%c5, %c0_7] : memref<8x128xf32, #tpu.memory_space<vmem>>, vector<1x32xf32>
    %c6 = arith.constant 6 : index
    %c0_8 = arith.constant 0 : index
    %7 = vector.load %arg4[%c6, %c0_8] : memref<8x128xf32, #tpu.memory_space<vmem>>, vector<1x128xf32>
    %cst = arith.constant dense<0.000000e+00> : vector<16xf32>
    %8 = vector.multi_reduction <add>, %0, %cst [1] : vector<16x32xf32> to vector<16xf32>
    %9 = vector.shape_cast %8 : vector<16xf32> to vector<16x1xf32>
    %cst_9 = arith.constant 3.200000e+01 : f32
    %10 = vector.broadcast %cst_9 : f32 to vector<16x1xf32>
    %11 = arith.divf %9, %10 : vector<16x1xf32>
    %12 = vector.broadcast %11 : vector<16x1xf32> to vector<16x32xf32>
    %13 = arith.subf %0, %12 : vector<16x32xf32>
    %14 = arith.mulf %13, %13 : vector<16x32xf32>
    %cst_10 = arith.constant dense<0.000000e+00> : vector<16xf32>
    %15 = vector.multi_reduction <add>, %14, %cst_10 [1] : vector<16x32xf32> to vector<16xf32>
    %16 = vector.shape_cast %15 : vector<16xf32> to vector<16x1xf32>
    %cst_11 = arith.constant 3.200000e+01 : f32
    %17 = vector.broadcast %cst_11 : f32 to vector<16x1xf32>
    %18 = arith.divf %16, %17 : vector<16x1xf32>
    %19 = vector.broadcast %11 : vector<16x1xf32> to vector<16x32xf32>
    %20 = arith.subf %0, %19 : vector<16x32xf32>
    %cst_12 = arith.constant 9.99999974E-6 : f32
    %21 = vector.broadcast %cst_12 : f32 to vector<16x1xf32>
    %22 = arith.addf %18, %21 : vector<16x1xf32>
    %23 = math.rsqrt %22 : vector<16x1xf32>
    %24 = vector.broadcast %23 : vector<16x1xf32> to vector<16x32xf32>
    %25 = arith.mulf %20, %24 : vector<16x32xf32>
    %26 = vector.broadcast %1 : vector<1x32xf32> to vector<16x32xf32>
    %27 = arith.mulf %25, %26 : vector<16x32xf32>
    %28 = vector.broadcast %2 : vector<1x32xf32> to vector<16x32xf32>
    %29 = arith.addf %27, %28 : vector<16x32xf32>
    %c0_13 = arith.constant 0 : index
    %c0_14 = arith.constant 0 : index
    %30 = vector.load %arg2[%c0_13, %c0_14] : memref<64x128xf32, #tpu.memory_space<vmem>>, vector<32x128xf32>
    %cst_15 = arith.constant dense<0.000000e+00> : vector<16x128xf32>
    %31 = tpu.matmul %29, %30, %cst_15 {dimension_numbers = #tpu.dot_dimension_numbers<[1], [0], [0], [1], [0, 0, 1, 1], [], []>} : vector<16x32xf32>, vector<32x128xf32>, vector<16x128xf32> -> vector<16x128xf32>
    %32 = tpu.iota {dimensions = array<i32: 0>} : vector<8x8xi32>
    %33 = tpu.iota {dimensions = array<i32: 1>} : vector<8x8xi32>
    %34 = arith.cmpi sle, %33, %32 : vector<8x8xi32>
    %35 = vector.shape_cast %34 : vector<8x8xi1> to vector<1x8x8xi1>
    %36 = vector.extract_strided_slice %31 {offsets = [0, 0], sizes = [16, 8], strides = [1, 1]} : vector<16x128xf32> to vector<16x8xf32>
    %37 = vector.shape_cast %36 : vector<16x8xf32> to vector<2x8x8xf32>
    %38 = vector.extract_strided_slice %31 {offsets = [0, 32], sizes = [16, 8], strides = [1, 1]} : vector<16x128xf32> to vector<16x8xf32>
    %39 = vector.shape_cast %38 : vector<16x8xf32> to vector<2x8x8xf32>
    %40 = vector.extract_strided_slice %31 {offsets = [0, 64], sizes = [16, 8], strides = [1, 1]} : vector<16x128xf32> to vector<16x8xf32>
    %41 = vector.shape_cast %40 : vector<16x8xf32> to vector<2x8x8xf32>
    "tpu.trace_start"() <{level = 10 : i32, message = "bqd,bkd->bqk"}> : () -> ()
    %cst_16 = arith.constant dense<0.000000e+00> : vector<2x8x8xf32>
    %42 = tpu.matmul %37, %39, %cst_16 {dimension_numbers = #tpu.dot_dimension_numbers<[2], [2], [1], [1], [0, 0, 0, 1, 1, 1], [0], [0]>} : vector<2x8x8xf32>, vector<2x8x8xf32>, vector<2x8x8xf32> -> vector<2x8x8xf32>
    %cst_17 = arith.constant 0xFF800000 : f32
    "tpu.trace_stop"() : () -> ()
    %43 = vector.shape_cast %35 : vector<1x8x8xi1> to vector<1x8x8xi1>
    %44 = vector.broadcast %43 : vector<1x8x8xi1> to vector<2x8x8xi1>
    %45 = vector.broadcast %cst_17 : f32 to vector<2x8x8xf32>
    %46 = arith.select %44, %42, %45 : vector<2x8x8xi1>, vector<2x8x8xf32>
    %cst_18 = arith.constant dense<0xFF800000> : vector<2x8xf32>
    %47 = vector.multi_reduction <maximumf>, %46, %cst_18 [2] : vector<2x8x8xf32> to vector<2x8xf32>
    %48 = vector.shape_cast %47 : vector<2x8xf32> to vector<2x8x1xf32>
    %49 = vector.broadcast %48 : vector<2x8x1xf32> to vector<2x8x8xf32>
    %50 = arith.subf %46, %49 : vector<2x8x8xf32>
    %51 = math.exp %50 : vector<2x8x8xf32>
    %cst_19 = arith.constant dense<0.000000e+00> : vector<2x8xf32>
    %52 = vector.multi_reduction <add>, %51, %cst_19 [2] : vector<2x8x8xf32> to vector<2x8xf32>
    %53 = vector.shape_cast %52 : vector<2x8xf32> to vector<2x8x1xf32>
    %54 = vector.broadcast %53 : vector<2x8x1xf32> to vector<2x8x8xf32>
    %55 = arith.divf %51, %54 : vector<2x8x8xf32>
    "tpu.trace_start"() <{level = 10 : i32, message = "bqk,bkd->bqd"}> : () -> ()
    %cst_20 = arith.constant dense<0.000000e+00> : vector<2x8x8xf32>
    %56 = tpu.matmul %55, %41, %cst_20 {dimension_numbers = #tpu.dot_dimension_numbers<[2], [1], [1], [2], [0, 0, 0, 1, 1, 2], [0], [0]>} : vector<2x8x8xf32>, vector<2x8x8xf32>, vector<2x8x8xf32> -> vector<2x8x8xf32>
    "tpu.trace_stop"() : () -> ()
    %57 = vector.shape_cast %56 : vector<2x8x8xf32> to vector<16x8xf32>
    %58 = vector.extract_strided_slice %31 {offsets = [0, 8], sizes = [16, 8], strides = [1, 1]} : vector<16x128xf32> to vector<16x8xf32>
    %59 = vector.shape_cast %58 : vector<16x8xf32> to vector<2x8x8xf32>
    %60 = vector.extract_strided_slice %31 {offsets = [0, 40], sizes = [16, 8], strides = [1, 1]} : vector<16x128xf32> to vector<16x8xf32>
    %61 = vector.shape_cast %60 : vector<16x8xf32> to vector<2x8x8xf32>
    %62 = vector.extract_strided_slice %31 {offsets = [0, 72], sizes = [16, 8], strides = [1, 1]} : vector<16x128xf32> to vector<16x8xf32>
    %63 = vector.shape_cast %62 : vector<16x8xf32> to vector<2x8x8xf32>
    "tpu.trace_start"() <{level = 10 : i32, message = "bqd,bkd->bqk"}> : () -> ()
    %cst_21 = arith.constant dense<0.000000e+00> : vector<2x8x8xf32>
    %64 = tpu.matmul %59, %61, %cst_21 {dimension_numbers = #tpu.dot_dimension_numbers<[2], [2], [1], [1], [0, 0, 0, 1, 1, 1], [0], [0]>} : vector<2x8x8xf32>, vector<2x8x8xf32>, vector<2x8x8xf32> -> vector<2x8x8xf32>
    %cst_22 = arith.constant 0xFF800000 : f32
    "tpu.trace_stop"() : () -> ()
    %65 = vector.shape_cast %35 : vector<1x8x8xi1> to vector<1x8x8xi1>
    %66 = vector.broadcast %65 : vector<1x8x8xi1> to vector<2x8x8xi1>
    %67 = vector.broadcast %cst_22 : f32 to vector<2x8x8xf32>
    %68 = arith.select %66, %64, %67 : vector<2x8x8xi1>, vector<2x8x8xf32>
    %cst_23 = arith.constant dense<0xFF800000> : vector<2x8xf32>
    %69 = vector.multi_reduction <maximumf>, %68, %cst_23 [2] : vector<2x8x8xf32> to vector<2x8xf32>
    %70 = vector.shape_cast %69 : vector<2x8xf32> to vector<2x8x1xf32>
    %71 = vector.broadcast %70 : vector<2x8x1xf32> to vector<2x8x8xf32>
    %72 = arith.subf %68, %71 : vector<2x8x8xf32>
    %73 = math.exp %72 : vector<2x8x8xf32>
    %cst_24 = arith.constant dense<0.000000e+00> : vector<2x8xf32>
    %74 = vector.multi_reduction <add>, %73, %cst_24 [2] : vector<2x8x8xf32> to vector<2x8xf32>
    %75 = vector.shape_cast %74 : vector<2x8xf32> to vector<2x8x1xf32>
    %76 = vector.broadcast %75 : vector<2x8x1xf32> to vector<2x8x8xf32>
    %77 = arith.divf %73, %76 : vector<2x8x8xf32>
    "tpu.trace_start"() <{level = 10 : i32, message = "bqk,bkd->bqd"}> : () -> ()
    %cst_25 = arith.constant dense<0.000000e+00> : vector<2x8x8xf32>
    %78 = tpu.matmul %77, %63, %cst_25 {dimension_numbers = #tpu.dot_dimension_numbers<[2], [1], [1], [2], [0, 0, 0, 1, 1, 2], [0], [0]>} : vector<2x8x8xf32>, vector<2x8x8xf32>, vector<2x8x8xf32> -> vector<2x8x8xf32>
    "tpu.trace_stop"() : () -> ()
    %79 = vector.shape_cast %78 : vector<2x8x8xf32> to vector<16x8xf32>
    %80 = vector.extract_strided_slice %31 {offsets = [0, 16], sizes = [16, 8], strides = [1, 1]} : vector<16x128xf32> to vector<16x8xf32>
    %81 = vector.shape_cast %80 : vector<16x8xf32> to vector<2x8x8xf32>
    %82 = vector.extract_strided_slice %31 {offsets = [0, 48], sizes = [16, 8], strides = [1, 1]} : vector<16x128xf32> to vector<16x8xf32>
    %83 = vector.shape_cast %82 : vector<16x8xf32> to vector<2x8x8xf32>
    %84 = vector.extract_strided_slice %31 {offsets = [0, 80], sizes = [16, 8], strides = [1, 1]} : vector<16x128xf32> to vector<16x8xf32>
    %85 = vector.shape_cast %84 : vector<16x8xf32> to vector<2x8x8xf32>
    "tpu.trace_start"() <{level = 10 : i32, message = "bqd,bkd->bqk"}> : () -> ()
    %cst_26 = arith.constant dense<0.000000e+00> : vector<2x8x8xf32>
    %86 = tpu.matmul %81, %83, %cst_26 {dimension_numbers = #tpu.dot_dimension_numbers<[2], [2], [1], [1], [0, 0, 0, 1, 1, 1], [0], [0]>} : vector<2x8x8xf32>, vector<2x8x8xf32>, vector<2x8x8xf32> -> vector<2x8x8xf32>
    %cst_27 = arith.constant 0xFF800000 : f32
    "tpu.trace_stop"() : () -> ()
    %87 = vector.shape_cast %35 : vector<1x8x8xi1> to vector<1x8x8xi1>
    %88 = vector.broadcast %87 : vector<1x8x8xi1> to vector<2x8x8xi1>
    %89 = vector.broadcast %cst_27 : f32 to vector<2x8x8xf32>
    %90 = arith.select %88, %86, %89 : vector<2x8x8xi1>, vector<2x8x8xf32>
    %cst_28 = arith.constant dense<0xFF800000> : vector<2x8xf32>
    %91 = vector.multi_reduction <maximumf>, %90, %cst_28 [2] : vector<2x8x8xf32> to vector<2x8xf32>
    %92 = vector.shape_cast %91 : vector<2x8xf32> to vector<2x8x1xf32>
    %93 = vector.broadcast %92 : vector<2x8x1xf32> to vector<2x8x8xf32>
    %94 = arith.subf %90, %93 : vector<2x8x8xf32>
    %95 = math.exp %94 : vector<2x8x8xf32>
    %cst_29 = arith.constant dense<0.000000e+00> : vector<2x8xf32>
    %96 = vector.multi_reduction <add>, %95, %cst_29 [2] : vector<2x8x8xf32> to vector<2x8xf32>
    %97 = vector.shape_cast %96 : vector<2x8xf32> to vector<2x8x1xf32>
    %98 = vector.broadcast %97 : vector<2x8x1xf32> to vector<2x8x8xf32>
    %99 = arith.divf %95, %98 : vector<2x8x8xf32>
    "tpu.trace_start"() <{level = 10 : i32, message = "bqk,bkd->bqd"}> : () -> ()
    %cst_30 = arith.constant dense<0.000000e+00> : vector<2x8x8xf32>
    %100 = tpu.matmul %99, %85, %cst_30 {dimension_numbers = #tpu.dot_dimension_numbers<[2], [1], [1], [2], [0, 0, 0, 1, 1, 2], [0], [0]>} : vector<2x8x8xf32>, vector<2x8x8xf32>, vector<2x8x8xf32> -> vector<2x8x8xf32>
    "tpu.trace_stop"() : () -> ()
    %101 = vector.shape_cast %100 : vector<2x8x8xf32> to vector<16x8xf32>
    %102 = vector.extract_strided_slice %31 {offsets = [0, 24], sizes = [16, 8], strides = [1, 1]} : vector<16x128xf32> to vector<16x8xf32>
    %103 = vector.shape_cast %102 : vector<16x8xf32> to vector<2x8x8xf32>
    %104 = vector.extract_strided_slice %31 {offsets = [0, 56], sizes = [16, 8], strides = [1, 1]} : vector<16x128xf32> to vector<16x8xf32>
    %105 = vector.shape_cast %104 : vector<16x8xf32> to vector<2x8x8xf32>
    %106 = vector.extract_strided_slice %31 {offsets = [0, 88], sizes = [16, 8], strides = [1, 1]} : vector<16x128xf32> to vector<16x8xf32>
    %107 = vector.shape_cast %106 : vector<16x8xf32> to vector<2x8x8xf32>
    "tpu.trace_start"() <{level = 10 : i32, message = "bqd,bkd->bqk"}> : () -> ()
    %cst_31 = arith.constant dense<0.000000e+00> : vector<2x8x8xf32>
    %108 = tpu.matmul %103, %105, %cst_31 {dimension_numbers = #tpu.dot_dimension_numbers<[2], [2], [1], [1], [0, 0, 0, 1, 1, 1], [0], [0]>} : vector<2x8x8xf32>, vector<2x8x8xf32>, vector<2x8x8xf32> -> vector<2x8x8xf32>
    %cst_32 = arith.constant 0xFF800000 : f32
    "tpu.trace_stop"() : () -> ()
    %109 = vector.shape_cast %35 : vector<1x8x8xi1> to vector<1x8x8xi1>
    %110 = vector.broadcast %109 : vector<1x8x8xi1> to vector<2x8x8xi1>
    %111 = vector.broadcast %cst_32 : f32 to vector<2x8x8xf32>
    %112 = arith.select %110, %108, %111 : vector<2x8x8xi1>, vector<2x8x8xf32>
    %cst_33 = arith.constant dense<0xFF800000> : vector<2x8xf32>
    %113 = vector.multi_reduction <maximumf>, %112, %cst_33 [2] : vector<2x8x8xf32> to vector<2x8xf32>
    %114 = vector.shape_cast %113 : vector<2x8xf32> to vector<2x8x1xf32>
    %115 = vector.broadcast %114 : vector<2x8x1xf32> to vector<2x8x8xf32>
    %116 = arith.subf %112, %115 : vector<2x8x8xf32>
    %117 = math.exp %116 : vector<2x8x8xf32>
    %cst_34 = arith.constant dense<0.000000e+00> : vector<2x8xf32>
    %118 = vector.multi_reduction <add>, %117, %cst_34 [2] : vector<2x8x8xf32> to vector<2x8xf32>
    %119 = vector.shape_cast %118 : vector<2x8xf32> to vector<2x8x1xf32>
    %120 = vector.broadcast %119 : vector<2x8x1xf32> to vector<2x8x8xf32>
    %121 = arith.divf %117, %120 : vector<2x8x8xf32>
    "tpu.trace_start"() <{level = 10 : i32, message = "bqk,bkd->bqd"}> : () -> ()
    %cst_35 = arith.constant dense<0.000000e+00> : vector<2x8x8xf32>
    %122 = tpu.matmul %121, %107, %cst_35 {dimension_numbers = #tpu.dot_dimension_numbers<[2], [1], [1], [2], [0, 0, 0, 1, 1, 2], [0], [0]>} : vector<2x8x8xf32>, vector<2x8x8xf32>, vector<2x8x8xf32> -> vector<2x8x8xf32>
    "tpu.trace_stop"() : () -> ()
    %123 = vector.shape_cast %122 : vector<2x8x8xf32> to vector<16x8xf32>
    %124 = tpu.concatenate %57, %79, %101, %123 in 1 : vector<16x8xf32>, vector<16x8xf32>, vector<16x8xf32>, vector<16x8xf32> -> vector<16x32xf32>
    %c0_36 = arith.constant 0 : index
    %c0_37 = arith.constant 0 : index
    %125 = vector.load %arg3[%c0_36, %c0_37] : memref<160x32xf32, #tpu.memory_space<vmem>>, vector<32x32xf32>
    %cst_38 = arith.constant dense<0.000000e+00> : vector<16x32xf32>
    %126 = tpu.matmul %124, %125, %cst_38 {dimension_numbers = #tpu.dot_dimension_numbers<[1], [0], [0], [1], [0, 0, 1, 1], [], []>} : vector<16x32xf32>, vector<32x32xf32>, vector<16x32xf32> -> vector<16x32xf32>
    %127 = vector.broadcast %5 : vector<1x32xf32> to vector<16x32xf32>
    %128 = arith.addf %126, %127 : vector<16x32xf32>
    %129 = arith.addf %0, %128 : vector<16x32xf32>
    %cst_39 = arith.constant dense<0.000000e+00> : vector<16xf32>
    %130 = vector.multi_reduction <add>, %129, %cst_39 [1] : vector<16x32xf32> to vector<16xf32>
    %131 = vector.shape_cast %130 : vector<16xf32> to vector<16x1xf32>
    %cst_40 = arith.constant 3.200000e+01 : f32
    %132 = vector.broadcast %cst_40 : f32 to vector<16x1xf32>
    %133 = arith.divf %131, %132 : vector<16x1xf32>
    %134 = vector.broadcast %133 : vector<16x1xf32> to vector<16x32xf32>
    %135 = arith.subf %129, %134 : vector<16x32xf32>
    %136 = arith.mulf %135, %135 : vector<16x32xf32>
    %cst_41 = arith.constant dense<0.000000e+00> : vector<16xf32>
    %137 = vector.multi_reduction <add>, %136, %cst_41 [1] : vector<16x32xf32> to vector<16xf32>
    %138 = vector.shape_cast %137 : vector<16xf32> to vector<16x1xf32>
    %cst_42 = arith.constant 3.200000e+01 : f32
    %139 = vector.broadcast %cst_42 : f32 to vector<16x1xf32>
    %140 = arith.divf %138, %139 : vector<16x1xf32>
    %141 = vector.broadcast %133 : vector<16x1xf32> to vector<16x32xf32>
    %142 = arith.subf %129, %141 : vector<16x32xf32>
    %cst_43 = arith.constant 9.99999974E-6 : f32
    %143 = vector.broadcast %cst_43 : f32 to vector<16x1xf32>
    %144 = arith.addf %140, %143 : vector<16x1xf32>
    %145 = math.rsqrt %144 : vector<16x1xf32>
    %146 = vector.broadcast %145 : vector<16x1xf32> to vector<16x32xf32>
    %147 = arith.mulf %142, %146 : vector<16x32xf32>
    %148 = vector.broadcast %3 : vector<1x32xf32> to vector<16x32xf32>
    %149 = arith.mulf %147, %148 : vector<16x32xf32>
    %150 = vector.broadcast %4 : vector<1x32xf32> to vector<16x32xf32>
    %151 = arith.addf %149, %150 : vector<16x32xf32>
    %c32 = arith.constant 32 : index
    %c0_44 = arith.constant 0 : index
    %152 = vector.load %arg2[%c32, %c0_44] : memref<64x128xf32, #tpu.memory_space<vmem>>, vector<32x128xf32>
    %cst_45 = arith.constant dense<0.000000e+00> : vector<16x128xf32>
    %153 = tpu.matmul %151, %152, %cst_45 {dimension_numbers = #tpu.dot_dimension_numbers<[1], [0], [0], [1], [0, 0, 1, 1], [], []>} : vector<16x32xf32>, vector<32x128xf32>, vector<16x128xf32> -> vector<16x128xf32>
    %154 = vector.broadcast %7 : vector<1x128xf32> to vector<16x128xf32>
    %155 = arith.addf %153, %154 : vector<16x128xf32>
    %cst_46 = arith.constant 0.000000e+00 : f32
    %156 = vector.broadcast %cst_46 : f32 to vector<16x128xf32>
    %157 = arith.maximumf %155, %156 : vector<16x128xf32>
    %c32_47 = arith.constant 32 : index
    %c0_48 = arith.constant 0 : index
    %158 = vector.load %arg3[%c32_47, %c0_48] : memref<160x32xf32, #tpu.memory_space<vmem>>, vector<128x32xf32>
    %cst_49 = arith.constant dense<0.000000e+00> : vector<16x32xf32>
    %159 = tpu.matmul %157, %158, %cst_49 {dimension_numbers = #tpu.dot_dimension_numbers<[1], [0], [0], [1], [0, 0, 1, 1], [], []>} : vector<16x128xf32>, vector<128x32xf32>, vector<16x32xf32> -> vector<16x32xf32>
    %160 = vector.broadcast %6 : vector<1x32xf32> to vector<16x32xf32>
    %161 = arith.addf %159, %160 : vector<16x32xf32>
    %162 = arith.addf %129, %161 : vector<16x32xf32>
    %c0_50 = arith.constant 0 : index
    %c0_51 = arith.constant 0 : index
    %163 = vector.load %arg5[%c0_50, %c0_51] : memref<16x32xf32, #tpu.memory_space<vmem>>, vector<16x32xf32>
    tpu.vector_store %arg5[%c0_50, %c0_51], %162 {strides = array<i32>} : memref<16x32xf32, #tpu.memory_space<vmem>>, vector<16x32xf32>,
    return
  }
  func.func @transform_0(%arg0: i32) -> (i32, i32) {
    %c0_i32 = arith.constant 0 : i32
    %c0_i32_0 = arith.constant 0 : i32
    %c0_i32_1 = arith.constant 0 : i32
    return %c0_i32, %c0_i32_0 : i32, i32
  }
  func.func @transform_1(%arg0: i32) -> (i32, i32) {
    %c0_i32 = arith.constant 0 : i32
    %c0_i32_0 = arith.constant 0 : i32
    %c0_i32_1 = arith.constant 0 : i32
    return %c0_i32, %c0_i32_0 : i32, i32
  }
  func.func @transform_2(%arg0: i32) -> (i32, i32) {
    %c0_i32 = arith.constant 0 : i32
    %c0_i32_0 = arith.constant 0 : i32
    %c0_i32_1 = arith.constant 0 : i32
    return %c0_i32, %c0_i32_0 : i32, i32
  }
  func.func @transform_3(%arg0: i32) -> (i32, i32) {
    %c0_i32 = arith.constant 0 : i32
    %c0_i32_0 = arith.constant 0 : i32
    %c0_i32_1 = arith.constant 0 : i32
    return %c0_i32, %c0_i32_0 : i32, i32
  }
  func.func @transform_4(%arg0: i32) -> (i32, i32) {
    %c0_i32 = arith.constant 0 : i32
    %c0_i32_0 = arith.constant 0 : i32
    %c0_i32_1 = arith.constant 0 : i32
    return %c0_i32, %c0_i32_0 : i32, i32
  }
}

</mosaic_0001>

<bundles_post_ra>
// kernel: transformer_block.1
= control target key start
LH: loop header
LB: loop body
LE: loop exit
PB: predicated region body
PF: predicated region fallthrough
CT: control target
= control target key end

     0   :  { %vm27_vm0 = vcmask 261120   ;;  %s2542_s0 = inlined_call_operand.vmem [shape: f32[16,32], index: 0, kind: input, shape index: {}]   ;;  %s2543_s1 = inlined_call_operand.vmem [shape: f32[64,128], index: 1, kind: input, shape index: {}]   ;;  %s2544_s2 = inlined_call_operand.vmem [shape: f32[160,32], index: 2, kind: input, shape index: {}]   ;;  %s2545_s3 = inlined_call_operand.vmem [shape: f32[8,128], index: 3, kind: input, shape index: {}]   ;;  %s2546_s4 = inlined_call_operand.hbm [shape: f32[16,32], index: 4, kind: output, shape index: {}]  }
   0x1   :  { %v2232_v0 = vld [vmem:[%s2542_s0] sm:$0xff]  ;;  %v2237_v1 = vld [vmem:[%s2542_s0 + $0x8] sm:$0xff] }
   0x2   :  { %9 = vsyncpa [#allocation3], 0  ;;  %v28_v2 = vsel %vm27_vm0, %v2232_v0, 0.0  ;;  %v31_v3 = vsel %vm27_vm0, %v2237_v1, 0.0  ;;  %v70_v14 = vld [vmem:[%s2543_s1 + $0x18] sm:$0xff]  ;;  %v69_v15 = vld [vmem:[%s2543_s1 + $0x10] sm:$0xff]  ;;  %v152_v39 = vlaneseq }
   0x3   :  { %29 = vadd.xlane.f32.xlu0 %v28_v2  ;;  %1958 = vmatprep.subr.mxu1 %v70_v14  ;;  %v68_v16 = vld [vmem:[%s2543_s1 + $0x8] sm:$0xff]  ;;  %v67_v17 = vld [vmem:[%s2543_s1] sm:$0xff]  ;;  %v2186_v34 = vmov 0.0   ;;  %vm2187_vm1 = vmmov 0   ;;  %s2188_s30 = smov 96   ;;  %vm160_vm2 = vcmask 64512  }
   0x4   :  { %1959 = vmatpush3.msra.mxu1 %v70_v14  ;;  %v1853_v25 = vld [vmem:[%s2545_s3] ss:$0 sm:$0xff]  ;;  %v1854_v27 = vld [vmem:[%s2545_s3 + $0x1] ss:$0 sm:$0xff]  ;;  %1979 = vmatprep.subr.mxu0 %v2186_v34  ;;  %v153_v40 = vshrl.u32 %v152_v39, 7  ;;  %v155_v41 = vand.u32 127, %v152_v39 }
   0x5   :  { %1960 = vmatprep.subr.mxu1 %v69_v15  ;;  %1981 = vmatprep.mubr.msk.f32.mxu0 %vm2187_vm1, %v2186_v34  ;;  %s2189_s5 = smov 64   ;;  %s2190_s6 = smov 88   ;;  %vm1515_vm4 = vcmask 195584   ;;  %vm1512_vm5 = vcmask 130048  }
   0x6   :  { %1961 = vmatpush3.msra.mxu1 %v69_v15  ;;  %vm2291_vm3 = vcmp.le.s32.totalorder %v155_v41, %v153_v40  ;;  %s2191_s7 = smov 120   ;;  %s2192_s8 = smov 56  }
   0x7   :  { %32 = vadd.xlane.f32.xlu0 %v31_v3  ;;  %1962 = vmatprep.subr.mxu1 %v68_v16  ;;  %s2193_s9 = smov 80   ;;  %s2194_s10 = smov 112  }
   0x8   :  { %1963 = vmatpush3.msra.mxu1 %v68_v16  ;;  %s2195_s11 = smov 48   ;;  %s2196_s12 = smov 72  }
   0x9   :  { %1964 = vmatprep.subr.mxu1 %v67_v17  ;;  %s2197_s13 = smov 104   ;;  %s2198_s14 = smov 40  }
   0xa   :  { %1965 = vmatpush3.msra.mxu1 %v67_v17  ;;  %s2199_s15 = smov 8   ;;  %s2200_s16 = smov 16  }
   0xb   :  { %1969 = vmatprep.subr.mxu1 %v2186_v34  ;;  %s2201_s24 = smov 24  }
  0x8c   :  { %v30_v4 = vpop.xlane.xlu0 %29 }
  0x8d   :  { %v35_v5 = vmul.f32 0.03125, %v30_v4 }
  0x8f   :  { %v37_v6 = vsub.f32 %v2232_v0, %v35_v5 }
  0x90   :  { %v33_v7 = vpop.xlane.xlu0 %32 }
  0x91   :  { %v36_v8 = vmul.f32 0.03125, %v33_v7  ;;  %v39_v9 = vmul.f32 %v37_v6, %v37_v6 }
  0x93   :  { %v38_v10 = vsub.f32 %v2237_v1, %v36_v8  ;;  %v41_v11 = vsel %vm27_vm0, %v39_v9, 0.0 }
  0x94   :  { %42 = vadd.xlane.f32.xlu1 %v41_v11 }
  0x95   :  { %v40_v12 = vmul.f32 %v38_v10, %v38_v10 }
  0x97   :  { %v44_v13 = vsel %vm27_vm0, %v40_v12, 0.0 }
  0x98   :  { %45 = vadd.xlane.f32.xlu1 %v44_v13 }
 0x11d   :  { %v43_v18 = vpop.xlane.xlu1 %42 }
 0x11e   :  { %v47_v19 = vmul.f32 0.03125, %v43_v18 }
 0x120   :  { %v49_v20 = vadd.f32 1e-05, %v47_v19 }
 0x121   :  { %v46_v21 = vpop.xlane.xlu1 %45 }
 0x122   :  { %2124 = vrsqrt.f32 %v49_v20  ;;  %v48_v22 = vmul.f32 0.03125, %v46_v21 }
 0x124   :  { %v50_v23 = vadd.f32 1e-05, %v48_v22 }
 0x126   :  { %2126 = vrsqrt.f32 %v50_v23 }
 0x12f   :  { %v2125_v24 = vpop.eup %2124 }
 0x130   :  { %v53_v26 = vmul.f32 %v2125_v24, %v37_v6 }
 0x132   :  { %v59_v28 = vmul.f32 %v1853_v25, %v53_v26 }
 0x133   :  { %v2127_v29 = vpop.eup %2126 }
 0x134   :  { %v54_v30 = vmul.f32 %v2127_v29, %v38_v10  ;;  %v65_v31 = vadd.f32 %v1854_v27, %v59_v28 }
 0x136   :  { %v60_v32 = vmul.f32 %v1853_v25, %v54_v30  ;;  %1966 = vmatprep.mubr.msk.f32.mxu1 %vm27_vm0, %v65_v31 }
 0x138   :  { %v66_v33 = vadd.f32 %v1854_v27, %v60_v32 }
 0x13a   :  { %1967 = vmatmul.mubr.msk.f32.vlgmr.msra.gmra.mxu1 %vm27_vm0, %v66_v33 }
 0x13b   :  { %1971 = vmatprep.mubr.msk.f32.mxu1 %vm2187_vm1, %v2186_v34 }
 0x1fa   :  { %v2273_v35 = vpop.f32.mrf.mxu1 }
 0x1fb   :  { %236 = vrot.lane.b32.xlu1 %v2273_v35, %s2188_s30 }
 0x1fc   :  { %v2276_v36 = vpop.f32.mrf.mxu1 }
 0x1fd   :  { %158 = vrot.lane.b32.xlu0 %v2276_v36, %s2188_s30 }
 0x26d   :  { %v237_v38 = vpop.permute.xlu1 %236 }
 0x26f   :  { %v159_v37 = vpop.permute.xlu0 %158 }
 0x270   :  { %1970 = vmatpush3.xpose.msk.msra.mxu1 %vm160_vm2, %v159_v37 }
 0x271   :  { %1974 = vmatprep.subr.mxu1 %v2186_v34 }
 0x273   :  { %1972 = vmatmul.mubr.msk.f32.vlgmr.msra.gmra.mxu1 %vm160_vm2, %v2276_v36 }
 0x274   :  { %1975 = vmatpush3.xpose.msk.msra.mxu1 %vm160_vm2, %v237_v38  ;;  %1976 = vmatprep.mubr.msk.f32.mxu1 %vm2187_vm1, %v2186_v34 }
 0x275   :  { %1984 = vmatprep.subr.mxu1 %v2186_v34 }
 0x277   :  { %1977 = vmatmul.mubr.msk.f32.vlgmr.msra.gmra.mxu1 %vm160_vm2, %v2273_v35 }
 0x278   :  { %1986 = vmatprep.mubr.msk.f32.mxu1 %vm2187_vm1, %v2186_v34 }
 0x333   :  { %v231_v43 = vpop.f32.mrf.mxu1 }
 0x334   :  { %v314_v44 = vsel %vm2291_vm3, %v231_v43, -inf }
 0x335   :  { %v1973_v45 = vpop.f32.mrf.mxu1  ;;  %v316_v46 = vsel %vm160_vm2, %v314_v44, -inf }
 0x336   :  { %317 = vmax.xlane.f32.xlu1 %v316_v46 }
 0x337   :  { %v308_v47 = vpop.f32.mrf.mxu1 }
 0x338   :  { %v315_v48 = vsel %vm2291_vm3, %v308_v47, -inf }
 0x339   :  { %v1978_v49 = vpop.f32.mrf.mxu1  ;;  %v319_v50 = vsel %vm160_vm2, %v315_v48, -inf }
 0x33a   :  { %320 = vmax.xlane.f32.xlu0 %v319_v50 }
 0x347   :  { %414 = vrot.lane.b32.xlu1 %v2273_v35, %s2189_s5 }
 0x34b   :  { %492 = vrot.lane.b32.xlu1 %v2276_v36, %s2190_s6 }
 0x34f   :  { %570 = vrot.lane.b32.xlu1 %v2273_v35, %s2190_s6 }
 0x3bf   :  { %v318_v51 = vpop.xlane.xlu1 %317 }
 0x3c0   :  { %v322_v52 = vsub.f32 %v314_v44, %v318_v51 }
 0x3c2   :  { %v324_v53 = vmul.f32 1.442695, %v322_v52 }
 0x3c3   :  { %v415_v54 = vpop.permute.xlu1 %414  ;;  %v321_v55 = vpop.xlane.xlu0 %320 }
 0x3c4   :  { %2128 = vpow2.f32 %v324_v53  ;;  %v323_v56 = vsub.f32 %v315_v48, %v321_v55  ;;  %1985 = vmatpush3.msra.mxu1 %v415_v54 }
 0x3c5   :  { %1994 = vmatprep.subr.mxu1 %v2186_v34 }
 0x3c6   :  { %v326_v57 = vmul.f32 1.442695, %v323_v56 }
 0x3c7   :  { %v493_v62 = vpop.permute.xlu1 %492 }
 0x3c8   :  { %2130 = vpow2.f32 %v326_v57 }
 0x3cb   :  { %v571_v63 = vpop.permute.xlu1 %570 }
 0x3d1   :  { %v2129_v58 = vpop.eup %2128 }
 0x3d2   :  { %v328_v59 = vsel %vm160_vm2, %v2129_v58, 0.0 }
 0x3d3   :  { %329 = vadd.xlane.f32.xlu0 %v328_v59 }
 0x3d5   :  { %v2131_v60 = vpop.eup %2130 }
 0x3d6   :  { %v331_v61 = vsel %vm160_vm2, %v2131_v60, 0.0 }
 0x3d7   :  { %332 = vadd.xlane.f32.xlu1 %v331_v61 }
 0x3e8   :  { %568 = vrot.lane.b32.xlu1 %v2273_v35, %s2191_s7 }
 0x3e9   :  { %338 = vrot.lane.b32.xlu0 %v2276_v36, %s2189_s5 }
 0x3ed   :  { %490 = vrot.lane.b32.xlu0 %v2276_v36, %s2191_s7 }
 0x45c   :  { %v330_v2 = vpop.xlane.xlu0 %329 }
 0x45d   :  { %2132 = vrcp.f32 %v330_v2 }
 0x460   :  { %v333_v3 = vpop.xlane.xlu1 %332  ;;  %v339_v4 = vpop.permute.xlu0 %338 }
 0x461   :  { %2134 = vrcp.f32 %v333_v3  ;;  %1980 = vmatpush3.msra.mxu0 %v339_v4 }
 0x462   :  { %1989 = vmatprep.subr.mxu0 %v2186_v34 }
 0x464   :  { %v491_v9 = vpop.permute.xlu0 %490  ;;  %v569_v10 = vpop.permute.xlu1 %568 }
 0x46a   :  { %v2133_v5 = vpop.eup %2132 }
 0x46b   :  { %v335_v6 = vmul.f32 %v2133_v5, %v2129_v58 }
 0x46d   :  { %1982 = vmatmul.mubr.msk.f32.vlgmr.msra.gmra.mxu0 %vm160_vm2, %v335_v6 }
 0x46e   :  { %v2135_v7 = vpop.eup %2134  ;;  %1990 = vmatpush3.xpose.msk.msra.mxu0 %vm160_vm2, %v493_v62  ;;  %1991 = vmatprep.mubr.msk.f32.mxu0 %vm2187_vm1, %v2186_v34 }
 0x46f   :  { %v337_v8 = vmul.f32 %v2135_v7, %v2131_v60  ;;  %1999 = vmatprep.subr.mxu0 %v2186_v34 }
 0x471   :  { %1987 = vmatmul.mubr.msk.f32.vlgmr.msra.gmra.mxu1 %vm160_vm2, %v337_v8  ;;  %1992 = vmatmul.mubr.msk.f32.vlgmr.msra.gmra.mxu0 %vm160_vm2, %v491_v9 }
 0x472   :  { %1995 = vmatpush3.xpose.msk.msra.mxu1 %vm160_vm2, %v571_v63  ;;  %1996 = vmatprep.mubr.msk.f32.mxu1 %vm2187_vm1, %v2186_v34 }
 0x473   :  { %2004 = vmatprep.subr.mxu1 %v2186_v34  ;;  %2001 = vmatprep.mubr.msk.f32.mxu0 %vm2187_vm1, %v2186_v34 }
 0x475   :  { %1997 = vmatmul.mubr.msk.f32.vlgmr.msra.gmra.mxu1 %vm160_vm2, %v569_v10 }
 0x476   :  { %2006 = vmatprep.mubr.msk.f32.mxu1 %vm2187_vm1, %v2186_v34 }
 0x52d   :  { %v2327_v11 = vpop.f32.mrf.mxu0 }
 0x52f   :  { %v1983_v12 = vpop.f32.mrf.mxu0 }
 0x531   :  { %v2329_v13 = vpop.f32.mrf.mxu1  ;;  %v564_v14 = vpop.f32.mrf.mxu0 }
 0x532   :  { %v646_v15 = vsel %vm2291_vm3, %v564_v14, -inf }
 0x533   :  { %v1988_v16 = vpop.f32.mrf.mxu1  ;;  %v1993_v17 = vpop.f32.mrf.mxu0  ;;  %v648_v18 = vsel %vm160_vm2, %v646_v15, -inf }
 0x534   :  { %649 = vmax.xlane.f32.xlu0 %v648_v18 }
 0x535   :  { %v642_v19 = vpop.f32.mrf.mxu1 }
 0x536   :  { %v647_v20 = vsel %vm2291_vm3, %v642_v19, -inf }
 0x537   :  { %v1998_v21 = vpop.f32.mrf.mxu1  ;;  %v651_v22 = vsel %vm160_vm2, %v647_v20, -inf }
 0x538   :  { %652 = vmax.xlane.f32.xlu1 %v651_v22 }
 0x549   :  { %746 = vrot.lane.b32.xlu1 %v2273_v35, %s2192_s8 }
 0x54a   :  { %670 = vrot.lane.b32.xlu0 %v2276_v36, %s2192_s8 }
 0x54d   :  { %824 = vrot.lane.b32.xlu1 %v2276_v36, %s2193_s9 }
 0x551   :  { %902 = vrot.lane.b32.xlu1 %v2273_v35, %s2193_s9 }
 0x555   :  { %900 = vrot.lane.b32.xlu1 %v2273_v35, %s2194_s10 }
 0x5bd   :  { %v650_v23 = vpop.xlane.xlu0 %649 }
 0x5be   :  { %v654_v24 = vsub.f32 %v646_v15, %v650_v23 }
 0x5c0   :  { %v656_v25 = vmul.f32 1.442695, %v654_v24 }
 0x5c1   :  { %v671_v26 = vpop.permute.xlu0 %670  ;;  %v653_v27 = vpop.xlane.xlu1 %652 }
 0x5c2   :  { %2136 = vpow2.f32 %v656_v25  ;;  %v655_v28 = vsub.f32 %v647_v20, %v653_v27  ;;  %2000 = vmatpush3.msra.mxu0 %v671_v26 }
 0x5c3   :  { %2009 = vmatprep.subr.mxu0 %v2186_v34 }
 0x5c4   :  { %v658_v29 = vmul.f32 1.442695, %v655_v28 }
 0x5c5   :  { %v747_v30 = vpop.permute.xlu1 %746 }
 0x5c6   :  { %2138 = vpow2.f32 %v658_v29  ;;  %2005 = vmatpush3.msra.mxu1 %v747_v30 }
 0x5c7   :  { %2014 = vmatprep.subr.mxu1 %v2186_v34 }
 0x5c9   :  { %v825_v40 = vpop.permute.xlu1 %824 }
 0x5cd   :  { %v903_v45 = vpop.permute.xlu1 %902 }
 0x5cf   :  { %v2137_v31 = vpop.eup %2136 }
 0x5d0   :  { %v660_v32 = vsel %vm160_vm2, %v2137_v31, 0.0 }
 0x5d1   :  { %661 = vadd.xlane.f32.xlu0 %v660_v32  ;;  %v901_v48 = vpop.permute.xlu1 %900 }
 0x5d3   :  { %v2139_v33 = vpop.eup %2138 }
 0x5d4   :  { %v663_v37 = vsel %vm160_vm2, %v2139_v33, 0.0 }
 0x5d5   :  { %664 = vadd.xlane.f32.xlu0 %v663_v37 }
 0x5eb   :  { %822 = vrot.lane.b32.xlu0 %v2276_v36, %s2194_s10 }
 0x65a   :  { %v662_v38 = vpop.xlane.xlu0 %661 }
 0x65b   :  { %2140 = vrcp.f32 %v662_v38 }
 0x65e   :  { %v665_v39 = vpop.xlane.xlu0 %664 }
 0x65f   :  { %2142 = vrcp.f32 %v665_v39 }
 0x662   :  { %v823_v47 = vpop.permute.xlu0 %822 }
 0x668   :  { %v2141_v41 = vpop.eup %2140 }
 0x669   :  { %v667_v43 = vmul.f32 %v2141_v41, %v2137_v31 }
 0x66b   :  { %2002 = vmatmul.mubr.msk.f32.vlgmr.msra.gmra.mxu0 %vm160_vm2, %v667_v43 }
 0x66c   :  { %v2143_v44 = vpop.eup %2142  ;;  %2010 = vmatpush3.xpose.msk.msra.mxu0 %vm160_vm2, %v825_v40  ;;  %2011 = vmatprep.mubr.msk.f32.mxu0 %vm2187_vm1, %v2186_v34 }
 0x66d   :  { %v669_v46 = vmul.f32 %v2143_v44, %v2139_v33  ;;  %2019 = vmatprep.subr.mxu0 %v2186_v34 }
 0x66f   :  { %2007 = vmatmul.mubr.msk.f32.vlgmr.msra.gmra.mxu1 %vm160_vm2, %v669_v46  ;;  %2012 = vmatmul.mubr.msk.f32.vlgmr.msra.gmra.mxu0 %vm160_vm2, %v823_v47 }
 0x670   :  { %2015 = vmatpush3.xpose.msk.msra.mxu1 %vm160_vm2, %v903_v45  ;;  %2016 = vmatprep.mubr.msk.f32.mxu1 %vm2187_vm1, %v2186_v34 }
 0x671   :  { %2024 = vmatprep.subr.mxu1 %v2186_v34  ;;  %2021 = vmatprep.mubr.msk.f32.mxu0 %vm2187_vm1, %v2186_v34 }
 0x673   :  { %2017 = vmatmul.mubr.msk.f32.vlgmr.msra.gmra.mxu1 %vm160_vm2, %v901_v48 }
 0x674   :  { %2026 = vmatprep.mubr.msk.f32.mxu1 %vm2187_vm1, %v2186_v34 }
 0x72b   :  { %v2363_v49 = vpop.f32.mrf.mxu0 }
 0x72d   :  { %v2003_v50 = vpop.f32.mrf.mxu0 }
 0x72f   :  { %v2365_v51 = vpop.f32.mrf.mxu1  ;;  %v896_v52 = vpop.f32.mrf.mxu0 }
 0x730   :  { %v978_v53 = vsel %vm2291_vm3, %v896_v52, -inf }
 0x731   :  { %v2008_v54 = vpop.f32.mrf.mxu1  ;;  %v2013_v55 = vpop.f32.mrf.mxu0  ;;  %v980_v56 = vsel %vm160_vm2, %v978_v53, -inf }
 0x732   :  { %981 = vmax.xlane.f32.xlu0 %v980_v56  ;;  %v1521_v54 = vld [vmem:[%s2544_s2 + $0x18] sm:$0xff]  ;;  %v1519_v55 = vld [vmem:[%s2544_s2 + $0x8] sm:$0xff]  ;;  %v1518_v56 = vld [vmem:[%s2544_s2] sm:$0xff] }
 0x733   :  { %v974_v57 = vpop.f32.mrf.mxu1 }
 0x734   :  { %v979_v58 = vsel %vm2291_vm3, %v974_v57, -inf }
 0x735   :  { %v2018_v59 = vpop.f32.mrf.mxu1  ;;  %v983_v60 = vsel %vm160_vm2, %v979_v58, -inf }
 0x736   :  { %984 = vmax.xlane.f32.xlu1 %v983_v60 }
 0x747   :  { %1078 = vrot.lane.b32.xlu1 %v2273_v35, %s2195_s11 }
 0x748   :  { %1002 = vrot.lane.b32.xlu0 %v2276_v36, %s2195_s11 }
 0x74b   :  { %1156 = vrot.lane.b32.xlu1 %v2276_v36, %s2196_s12 }
 0x74f   :  { %1234 = vrot.lane.b32.xlu1 %v2273_v35, %s2196_s12 }
 0x753   :  { %1232 = vrot.lane.b32.xlu1 %v2273_v35, %s2197_s13 }
 0x7bb   :  { %v982_v61 = vpop.xlane.xlu0 %981 }
 0x7bc   :  { %v986_v62 = vsub.f32 %v978_v53, %v982_v61 }
 0x7be   :  { %v988_v63 = vmul.f32 1.442695, %v986_v62 }
 0x7bf   :  { %v1003_v2 = vpop.permute.xlu0 %1002  ;;  %v985_v3 = vpop.xlane.xlu1 %984 }
 0x7c0   :  { %2144 = vpow2.f32 %v988_v63  ;;  %v987_v4 = vsub.f32 %v979_v58, %v985_v3  ;;  %2020 = vmatpush3.msra.mxu0 %v1003_v2 }
 0x7c1   :  { %2029 = vmatprep.subr.mxu0 %v2186_v34 }
 0x7c2   :  { %v990_v5 = vmul.f32 1.442695, %v987_v4 }
 0x7c3   :  { %v1079_v6 = vpop.permute.xlu1 %1078 }
 0x7c4   :  { %2146 = vpow2.f32 %v990_v5  ;;  %2025 = vmatpush3.msra.mxu1 %v1079_v6 }
 0x7c5   :  { %2034 = vmatprep.subr.mxu1 %v2186_v34 }
 0x7c7   :  { %v1157_v15 = vpop.permute.xlu1 %1156 }
 0x7cb   :  { %v1235_v19 = vpop.permute.xlu1 %1234 }
 0x7cd   :  { %v2145_v7 = vpop.eup %2144 }
 0x7ce   :  { %v992_v8 = vsel %vm160_vm2, %v2145_v7, 0.0 }
 0x7cf   :  { %993 = vadd.xlane.f32.xlu0 %v992_v8  ;;  %v1233_v22 = vpop.permute.xlu1 %1232 }
 0x7d1   :  { %v2147_v9 = vpop.eup %2146 }
 0x7d2   :  { %v995_v10 = vsel %vm160_vm2, %v2147_v9, 0.0 }
 0x7d3   :  { %996 = vadd.xlane.f32.xlu0 %v995_v10 }
 0x7e9   :  { %1154 = vrot.lane.b32.xlu0 %v2276_v36, %s2197_s13 }
 0x858   :  { %v994_v12 = vpop.xlane.xlu0 %993 }
 0x859   :  { %2148 = vrcp.f32 %v994_v12  ;;  %v1881_v12 = vld [vmem:[%s2545_s3 + $0x4] ss:$0 sm:$0xff] }
 0x85c   :  { %v997_v14 = vpop.xlane.xlu0 %996 }
 0x85d   :  { %2150 = vrcp.f32 %v997_v14 }
 0x860   :  { %v1155_v21 = vpop.permute.xlu0 %1154 }
 0x866   :  { %v2149_v16 = vpop.eup %2148 }
 0x867   :  { %v999_v17 = vmul.f32 %v2149_v16, %v2145_v7 }
 0x869   :  { %2022 = vmatmul.mubr.msk.f32.vlgmr.msra.gmra.mxu0 %vm160_vm2, %v999_v17 }
 0x86a   :  { %v2151_v18 = vpop.eup %2150  ;;  %2030 = vmatpush3.xpose.msk.msra.mxu0 %vm160_vm2, %v1157_v15  ;;  %2031 = vmatprep.mubr.msk.f32.mxu0 %vm2187_vm1, %v2186_v34 }
 0x86b   :  { %v1001_v20 = vmul.f32 %v2151_v18, %v2147_v9  ;;  %2039 = vmatprep.subr.mxu0 %v2186_v34 }
 0x86d   :  { %2027 = vmatmul.mubr.msk.f32.vlgmr.msra.gmra.mxu1 %vm160_vm2, %v1001_v20  ;;  %2032 = vmatmul.mubr.msk.f32.vlgmr.msra.gmra.mxu0 %vm160_vm2, %v1155_v21 }
 0x86e   :  { %2035 = vmatpush3.xpose.msk.msra.mxu1 %vm160_vm2, %v1235_v19  ;;  %2036 = vmatprep.mubr.msk.f32.mxu1 %vm2187_vm1, %v2186_v34 }
 0x86f   :  { %2044 = vmatprep.subr.mxu1 %v2186_v34  ;;  %2041 = vmatprep.mubr.msk.f32.mxu0 %vm2187_vm1, %v2186_v34 }
 0x871   :  { %2037 = vmatmul.mubr.msk.f32.vlgmr.msra.gmra.mxu1 %vm160_vm2, %v1233_v22 }
 0x872   :  { %2046 = vmatprep.mubr.msk.f32.mxu1 %vm2187_vm1, %v2186_v34 }
 0x929   :  { %v1074_v23 = vpop.f32.mrf.mxu0 }
 0x92b   :  { %v2023_v24 = vpop.f32.mrf.mxu0 }
 0x92d   :  { %v1150_v25 = vpop.f32.mrf.mxu1  ;;  %v1228_v26 = vpop.f32.mrf.mxu0 }
 0x92e   :  { %v1310_v27 = vsel %vm2291_vm3, %v1228_v26, -inf }
 0x92f   :  { %v2028_v28 = vpop.f32.mrf.mxu1  ;;  %v2033_v29 = vpop.f32.mrf.mxu0  ;;  %v1312_v30 = vsel %vm160_vm2, %v1310_v27, -inf }
 0x930   :  { %1313 = vmax.xlane.f32.xlu0 %v1312_v30  ;;  %v1650_v28 = vld [vmem:[%s2543_s1 + $0x38] sm:$0xff]  ;;  %v1649_v29 = vld [vmem:[%s2543_s1 + $0x30] sm:$0xff]  ;;  %v1648_v30 = vld [vmem:[%s2543_s1 + $0x28] sm:$0xff] }
 0x931   :  { %v1306_v31 = vpop.f32.mrf.mxu1 }
 0x932   :  { %v1311_v32 = vsel %vm2291_vm3, %v1306_v31, -inf  ;;  %v1647_v31 = vld [vmem:[%s2543_s1 + $0x20] sm:$0xff] }
 0x933   :  { %v2038_v33 = vpop.f32.mrf.mxu1  ;;  %v1315_v37 = vsel %vm160_vm2, %v1311_v32, -inf }
 0x934   :  { %1316 = vmax.xlane.f32.xlu1 %v1315_v37  ;;  %v1752_v33 = vld [vmem:[%s2544_s2 + $0x90] sm:$0xff]  ;;  %v1751_v37 = vld [vmem:[%s2544_s2 + $0x88] sm:$0xff] }
 0x945   :  { %1410 = vrot.lane.b32.xlu1 %v2273_v35, %s2198_s14 }
 0x949   :  { %1488 = vrot.lane.b32.xlu1 %v2363_v49, %s2199_s15 }
 0x94d   :  { %1490 = vrot.lane.b32.xlu1 %v2365_v51, %s2199_s15 }
 0x951   :  { %1498 = vrot.lane.b32.xlu1 %v1150_v25, %s2200_s16 }
 0x9b9   :  { %v1314_v34 = vpop.xlane.xlu0 %1313 }
 0x9ba   :  { %v1318_v38 = vsub.f32 %v1310_v27, %v1314_v34  ;;  %v1750_v34 = vld [vmem:[%s2544_s2 + $0x80] sm:$0xff] }
 0x9bc   :  { %v1320_v42 = vmul.f32 1.442695, %v1318_v38  ;;  %v1749_v38 = vld [vmem:[%s2544_s2 + $0x78] sm:$0xff] }
 0x9bd   :  { %v1317_v39 = vpop.xlane.xlu1 %1316 }
 0x9be   :  { %2152 = vpow2.f32 %v1320_v42  ;;  %v1319_v40 = vsub.f32 %v1311_v32, %v1317_v39  ;;  %v1753_v32 = vld [vmem:[%s2544_s2 + $0x98] sm:$0xff]  ;;  %v1748_v42 = vld [vmem:[%s2544_s2 + $0x70] sm:$0xff]  ;;  %v1747_v39 = vld [vmem:[%s2544_s2 + $0x68] sm:$0xff] }
 0x9c0   :  { %v1322_v41 = vmul.f32 1.442695, %v1319_v40  ;;  %v1746_v40 = vld [vmem:[%s2544_s2 + $0x60] sm:$0xff] }
 0x9c1   :  { %v1411_v43 = vpop.permute.xlu1 %1410 }
 0x9c2   :  { %2154 = vpow2.f32 %v1322_v41  ;;  %2045 = vmatpush3.msra.mxu1 %v1411_v43  ;;  %v1745_v41 = vld [vmem:[%s2544_s2 + $0x58] sm:$0xff]  ;;  %v1744_v43 = vld [vmem:[%s2544_s2 + $0x50] sm:$0xff] }
 0x9c3   :  { %2049 = vmatprep.subr.mxu1 %v1521_v54 }
 0x9c5   :  { %v1489_v61 = vpop.permute.xlu1 %1488 }
 0x9c6   :  { %v1510_v2 = vsel %vm160_vm2, %v2327_v11, %v1489_v61  ;;  %v1740_v61 = vld [vmem:[%s2544_s2 + $0x30] sm:$0xff] }
 0x9c9   :  { %v1491_v62 = vpop.permute.xlu1 %1490 }
 0x9ca   :  { %v1511_v7 = vsel %vm160_vm2, %v2329_v13, %v1491_v62  ;;  %v1739_v62 = vld [vmem:[%s2544_s2 + $0x28] sm:$0xff] }
 0x9cb   :  { %v2153_v35 = vpop.eup %2152 }
 0x9cc   :  { %v1324_v44 = vsel %vm160_vm2, %v2153_v35, 0.0 }
 0x9cd   :  { %1325 = vadd.xlane.f32.xlu0 %v1324_v44  ;;  %v1499_v3 = vpop.permute.xlu1 %1498  ;;  %v1742_v44 = vld [vmem:[%s2544_s2 + $0x40] sm:$0xff] }
 0x9ce   :  { %v1514_v8 = vsel %vm1512_vm5, %v1511_v7, %v1499_v3 }
 0x9cf   :  { %v2155_v45 = vpop.eup %2154 }
 0x9d0   :  { %v1327_v46 = vsel %vm160_vm2, %v2155_v45, 0.0 }
 0x9d1   :  { %1328 = vadd.xlane.f32.xlu0 %v1327_v46 }
 0x9e7   :  { %1334 = vrot.lane.b32.xlu0 %v2276_v36, %s2198_s14  ;;  %v1520_v36 = vld [vmem:[%s2544_s2 + $0x10] sm:$0xff] }
 0x9eb   :  { %1496 = vrot.lane.b32.xlu0 %v1074_v23, %s2200_s16 }
 0xa56   :  { %v1326_v47 = vpop.xlane.xlu0 %1325 }
 0xa57   :  { %2156 = vrcp.f32 %v1326_v47 }
 0xa5a   :  { %v1329_v48 = vpop.xlane.xlu0 %1328 }
 0xa5b   :  { %2158 = vrcp.f32 %v1329_v48 }
 0xa5e   :  { %v1335_v49 = vpop.permute.xlu0 %1334 }
 0xa5f   :  { %2040 = vmatpush3.msra.mxu0 %v1335_v49 }
 0xa60   :  { %2071 = vmatprep.subr.mxu0 %v1753_v32 }
 0xa62   :  { %v1497_v63 = vpop.permute.xlu0 %1496 }
 0xa63   :  { %v1513_v4 = vsel %vm1512_vm5, %v1510_v2, %v1497_v63  ;;  %v1738_v63 = vld [vmem:[%s2544_s2 + $0x20] sm:$0xff] }
 0xa64   :  { %v2157_v50 = vpop.eup %2156  ;;  %v1886_v2 = vld [vmem:[%s2545_s3 + $0x6] ss:$0 sm:$0xff] }
 0xa65   :  { %v1331_v51 = vmul.f32 %v2157_v50, %v2153_v35  ;;  %v1743_v35 = vld [vmem:[%s2544_s2 + $0x48] sm:$0xff] }
 0xa67   :  { %2042 = vmatmul.mubr.msk.f32.vlgmr.msra.gmra.mxu0 %vm160_vm2, %v1331_v51 }
 0xa68   :  { %v2159_v52 = vpop.eup %2158  ;;  %2072 = vmatpush3.msra.mxu0 %v1753_v32 }
 0xa69   :  { %v1333_v53 = vmul.f32 %v2159_v52, %v2155_v45  ;;  %2073 = vmatprep.subr.mxu0 %v1752_v33  ;;  %v1884_v52 = vld [vmem:[%s2545_s3 + $0x2] ss:$0 sm:$0xff] }
 0xa6a   :  { %2074 = vmatpush3.msra.mxu0 %v1752_v33 }
 0xa6b   :  { %2047 = vmatmul.mubr.msk.f32.vlgmr.msra.gmra.mxu1 %vm160_vm2, %v1333_v53  ;;  %2075 = vmatprep.subr.mxu0 %v1751_v37 }
 0xa6c   :  { %2050 = vmatpush3.msra.mxu1 %v1521_v54  ;;  %2076 = vmatpush3.msra.mxu0 %v1751_v37  ;;  %v1885_v54 = vld [vmem:[%s2545_s3 + $0x3] ss:$0 sm:$0xff] }
 0xa6d   :  { %2051 = vmatprep.subr.mxu1 %v1520_v36  ;;  %2077 = vmatprep.subr.mxu0 %v1750_v34 }
 0xa6e   :  { %2052 = vmatpush3.msra.mxu1 %v1520_v36  ;;  %2078 = vmatpush3.msra.mxu0 %v1750_v34 }
 0xa6f   :  { %2053 = vmatprep.subr.mxu1 %v1519_v55  ;;  %2079 = vmatprep.subr.mxu0 %v1749_v38 }
 0xa70   :  { %2054 = vmatpush3.msra.mxu1 %v1519_v55  ;;  %2080 = vmatpush3.msra.mxu0 %v1749_v38 }
 0xa71   :  { %2055 = vmatprep.subr.mxu1 %v1518_v56  ;;  %2081 = vmatprep.subr.mxu0 %v1748_v42 }
 0xa72   :  { %2056 = vmatpush3.msra.mxu1 %v1518_v56  ;;  %2082 = vmatpush3.msra.mxu0 %v1748_v42 }
 0xa73   :  { %2060 = vmatprep.subr.mxu1 %v1650_v28  ;;  %2083 = vmatprep.subr.mxu0 %v1747_v39 }
 0xa74   :  { %2084 = vmatpush3.msra.mxu0 %v1747_v39 }
 0xa75   :  { %2085 = vmatprep.subr.mxu0 %v1746_v40 }
 0xa76   :  { %2086 = vmatpush3.msra.mxu0 %v1746_v40 }
 0xa77   :  { %2087 = vmatprep.subr.mxu0 %v1745_v41 }
 0xa78   :  { %2088 = vmatpush3.msra.mxu0 %v1745_v41 }
 0xa79   :  { %2089 = vmatprep.subr.mxu0 %v1744_v43 }
 0xa7a   :  { %2090 = vmatpush3.msra.mxu0 %v1744_v43 }
 0xa7b   :  { %2091 = vmatprep.subr.mxu0 %v1743_v35 }
 0xa7c   :  { %2092 = vmatpush3.msra.mxu0 %v1743_v35 }
 0xa7d   :  { %2093 = vmatprep.subr.mxu0 %v1742_v44 }
 0xa7e   :  { %2094 = vmatpush3.msra.mxu0 %v1742_v44 }
 0xb27   :  { %v1406_v57 = vpop.f32.mrf.mxu0 }
 0xb28   :  { %1504 = vrot.lane.b32.xlu0 %v1406_v57, %s2201_s24 }
 0xb29   :  { %v2043_v58 = vpop.f32.mrf.mxu0 }
 0xb2b   :  { %v1482_v59 = vpop.f32.mrf.mxu1 }
 0xb2c   :  { %1506 = vrot.lane.b32.xlu1 %v1482_v59, %s2201_s24 }
 0xb2d   :  { %v2048_v60 = vpop.f32.mrf.mxu1 }
 0xb2e   :  { %v1741_v60 = vld [vmem:[%s2544_s2 + $0x38] sm:$0xff]  ;;  %s2202_s2 = smov [#allocation2]  }
 0xb2f   :  { %2095 = vmatprep.subr.mxu0 %v1741_v60  ;;  %s1842_s21 = sshll.u32 %s2202_s2, 4  ;;  %s1843_s21 = int_to_ptr.vmem [resolvable:$true] %s1842_s21 }
 0xb30   :  { %2096 = vmatpush3.msra.mxu0 %v1741_v60  ;;  %s2164_s22 = scalar_lea.vmem %s1843_s21, 256  ;;  %p2169_p1 = scmp.lt.s32.totalorder %s1843_s21, %s1843_s21 }
 0xb31   :  { %2097 = vmatprep.subr.mxu0 %v1740_v61  ;;  %p2165_p0 = scmp.ne.s32.totalorder %s1843_s21, %s2164_s22  ;;  %p2170_p2 = scmp.lt.s32.totalorder %s2164_s22, %s2164_s22 }
 0xb32   :  { %2098 = vmatpush3.msra.mxu0 %v1740_v61 }
 0xb33   :  { %2099 = vmatprep.subr.mxu0 %v1739_v62  ;;  %p2171_p3 = por %p2170_p2, %p2169_p1 }
 0xb34   :  { %2100 = vmatpush3.msra.mxu0 %v1739_v62 }
 0xb35   :  { %2101 = vmatprep.subr.mxu0 %v1738_v63  ;;  %p2172_p4 = pnand %p2171_p3, %p2165_p0 }
 0xb36   :  { %2102 = vmatpush3.msra.mxu0 %v1738_v63 }
 0xb9a   :  { %v1505_v5 = vpop.permute.xlu0 %1504 }
 0xb9b   :  { %v1516_v6 = vsel %vm1515_vm4, %v1513_v4, %v1505_v5 }
 0xb9c   :  { %2057 = vmatprep.mubr.msk.f32.mxu1 %vm27_vm0, %v1516_v6 }
 0xb9e   :  { %v1507_v9 = vpop.permute.xlu1 %1506 }
 0xb9f   :  { %v1517_v10 = vsel %vm1515_vm4, %v1514_v8, %v1507_v9  ;;  %v1889_v9 = vld [vmem:[%s2545_s3 + $0x5] ss:$0 sm:$0xff] }
 0xba0   :  { %2058 = vmatmul.mubr.msk.f32.vlgmr.msra.gmra.mxu1 %vm27_vm0, %v1517_v10 }
 0xba1   :  { %2061 = vmatpush3.msra.mxu1 %v1650_v28 }
 0xba2   :  { %2062 = vmatprep.subr.mxu1 %v1649_v29 }
 0xba3   :  { %2063 = vmatpush3.msra.mxu1 %v1649_v29 }
 0xba4   :  { %2064 = vmatprep.subr.mxu1 %v1648_v30 }
 0xba5   :  { %2065 = vmatpush3.msra.mxu1 %v1648_v30 }
 0xba6   :  { %2066 = vmatprep.subr.mxu1 %v1647_v31 }
 0xba7   :  { %2067 = vmatpush3.msra.mxu1 %v1647_v31 }
 0xc60   :  { %v2059_v11 = vpop.f32.mrf.mxu1 }
 0xc61   :  { %v1604_v14 = vadd.f32 %v2059_v11, %v1881_v12 }
 0xc62   :  { %v1598_v15 = vpop.f32.mrf.mxu1 }
 0xc63   :  { %v2437_v16 = vadd.f32 %v1604_v14, %v2237_v1  ;;  %v1599_v17 = vadd.f32 %v1881_v12, %v1598_v15 }
 0xc65   :  { %v2440_v18 = vadd.f32 %v1599_v17, %v2232_v0  ;;  %v1612_v13 = vsel %vm27_vm0, %v2437_v16, 0.0 }
 0xc66   :  { %1613 = vadd.xlane.f32.xlu1 %v1612_v13 }
 0xc67   :  { %v1609_v19 = vsel %vm27_vm0, %v2440_v18, 0.0 }
 0xc68   :  { %1610 = vadd.xlane.f32.xlu0 %v1609_v19 }
 0xcef   :  { %v1614_v20 = vpop.xlane.xlu1 %1613 }
 0xcf0   :  { %v1616_v21 = vmul.f32 0.03125, %v1614_v20 }
 0xcf1   :  { %v1611_v22 = vpop.xlane.xlu0 %1610 }
 0xcf2   :  { %v1615_v23 = vmul.f32 0.03125, %v1611_v22  ;;  %v2447_v24 = vsub.f32 %v2437_v16, %v1616_v21 }
 0xcf4   :  { %v2450_v1 = vsub.f32 %v2440_v18, %v1615_v23  ;;  %v1620_v26 = vmul.f32 %v2447_v24, %v2447_v24 }
 0xcf6   :  { %v1619_v0 = vmul.f32 %v2450_v1, %v2450_v1  ;;  %v1624_v27 = vsel %vm27_vm0, %v1620_v26, 0.0 }
 0xcf8   :  { %v1621_v25 = vsel %vm27_vm0, %v1619_v0, 0.0 }
 0xcf9   :  { %1622 = vadd.xlane.f32.xlu0 %v1621_v25 }
 0xcfd   :  { %1625 = vadd.xlane.f32.xlu0 %v1624_v27 }
 0xd82   :  { %v1623_v45 = vpop.xlane.xlu0 %1622 }
 0xd83   :  { %v1627_v46 = vmul.f32 0.03125, %v1623_v45 }
 0xd85   :  { %v1629_v47 = vadd.f32 1e-05, %v1627_v46 }
 0xd86   :  { %v1626_v48 = vpop.xlane.xlu0 %1625 }
 0xd87   :  { %2160 = vrsqrt.f32 %v1629_v47  ;;  %v1628_v49 = vmul.f32 0.03125, %v1626_v48 }
 0xd89   :  { %v1630_v50 = vadd.f32 1e-05, %v1628_v49 }
 0xd8b   :  { %2162 = vrsqrt.f32 %v1630_v50 }
 0xd94   :  { %v2161_v51 = vpop.eup %2160 }
 0xd95   :  { %v1633_v53 = vmul.f32 %v2161_v51, %v2450_v1 }
 0xd97   :  { %v1639_v36 = vmul.f32 %v1884_v52, %v1633_v53 }
 0xd98   :  { %v2163_v55 = vpop.eup %2162 }
 0xd99   :  { %v1634_v56 = vmul.f32 %v2163_v55, %v2447_v24  ;;  %v1645_v57 = vadd.f32 %v1885_v54, %v1639_v36 }
 0xd9b   :  { %v1640_v58 = vmul.f32 %v1884_v52, %v1634_v56  ;;  %2068 = vmatprep.mubr.msk.f32.mxu1 %vm27_vm0, %v1645_v57 }
 0xd9d   :  { %v1646_v59 = vadd.f32 %v1885_v54, %v1640_v58 }
 0xd9f   :  { %2069 = vmatmul.mubr.msk.f32.vlgmr.msra.gmra.mxu1 %vm27_vm0, %v1646_v59 }
 0xe5f   :  { %v2070_v3 = vpop.f32.mrf.mxu1 }
 0xe60   :  { %v1733_v4 = vadd.f32 %v2070_v3, %v1886_v2 }
 0xe61   :  { %v1727_v5 = vpop.f32.mrf.mxu1 }
 0xe62   :  { %v1728_v6 = vadd.f32 %v1886_v2, %v1727_v5  ;;  %v1737_v8 = vmax.f32 %v1733_v4, 0.0 }
 0xe64   :  { %v1736_v7 = vmax.f32 %v1728_v6, 0.0 }
 0xe66   :  { %2103 = vmatprep.mubr.f32.mxu0 %v1736_v7 }
 0xe67   :  { %2104 = vmatmul.mubr.f32.vlgmr.msra.gmra.mxu0 %v1737_v8 }
 0xf27   :  { %v2105_v10 = vpop.f32.mrf.mxu0 }
 0xf28   :  { %v1830_v12 = vadd.f32 %v2105_v10, %v1889_v9 }
 0xf29   :  { %v1824_v11 = vpop.f32.mrf.mxu0 }
 0xf2a   :  { %v1834_v14 = vadd.f32 %v1830_v12, %v2437_v16  ;;  %v1825_v15 = vadd.f32 %v1889_v9, %v1824_v11 }
 0xf2c   :  { %1836 = vst.msk [vmem:[#allocation2 + $0x8] sm:$0xff] %vm27_vm0, %v1834_v14  ;;  %v1833_v17 = vadd.f32 %v1825_v15, %v2440_v18 }
 0xf2e   :  { %1835 = vst.msk [vmem:[#allocation2] sm:$0xff] %vm27_vm0, %v1833_v17 }
 0xf2f   :  { %2175 = shalt.err (!%p2172_p4)
}
 0xf30   :  { %s2203_s3 = smov 128  }
 0xf31   :  { %1848 = dma.vmem_to_hbm [thread:$0]  %s1843_s21, 256, %s2546_s4, [#allocation3], %s2203_s3, %s2203_s3, %s2199_s15  }
 0xf32   :  { %2184 = dma.done.wait [#allocation3], 256  }
 0xf33   :  { %2185 = vsyncadd [#allocation3], 4294967040 }
 0xf34   :  { %1852 = vsyncpa [#allocation3], 1 }

</bundles_post_ra>
